<compile_context>
chip_gen: v7x
topology: tpu7x:2x2x1
jax: 0.10.0
libtpu: 0.0.40
codegen_flags: <defaults>
</compile_context>

<pallas_src>
import math

import jax
import jax.numpy as jnp
from jax import lax
from jax.experimental import pallas as pl
from jax.experimental.pallas import tpu as pltpu

_CLAMP_LO = math.log10(1.0 + 0.1 / 140.0)


def _make_weight_mae_kernel(m_total: int, tm: int, n: int):
    """Kernel closed over static shape info (row count, tile rows, width)."""
    ragged = (m_total % tm) != 0

    def kernel(yt_ref, yp_ref, wcol_ref, poscol_ref, arow_ref):
        yt = yt_ref[...]                       # (tm, N), native dtype
        yp = yp_ref[...]

        # Elementwise hot path on the VPU, kept in the native dtype (bf16 vregs
        # hold 2x elements on v6e/v7x); reductions accumulate in f32.
        w = jnp.clip(yt, _CLAMP_LO, 1.0)       # weights
        a = jnp.abs(yp - yt)                   # |diff|  (MAE, not MSE)
        pos = (yt > 0).astype(jnp.float32)     # indicator for `num`

        if ragged:
            # Static branch: only emitted when M % tm != 0.  Cheap (tm, 1) sublane
            # iota; only the column-sums need masking (OOB rows of the row-sum are
            # sliced away in the wrapper, so |diff| itself needs no mask).
            row = pl.program_id(0) * tm + lax.broadcasted_iota(jnp.int32, (tm, 1), 0)
            valid = row < m_total
            w = jnp.where(valid, w, jnp.zeros_like(w))
            pos = jnp.where(valid, pos, 0.0)

        # Column sums over rows: naturally lane-dense (1, N).
        wcol_ref[...] = jnp.sum(w, axis=0, keepdims=True,
                                dtype=jnp.float32).reshape(1, 1, n)
        poscol_ref[...] = jnp.sum(pos, axis=0, keepdims=True).reshape(1, 1, n)

        # Row sums over columns, emitted lane-dense as (1, tm): a ones-vector NT
        # matmul on the idle MXU yields the lane-major layout directly (no
        # sublane->lane relayout, no masked narrow stores, VPU slots stay free).
        ones_row = jnp.ones((1, n), dtype=a.dtype)
        rowsum = jnp.einsum("qd,kd->qk", ones_row, a,
                            precision=jax.lax.Precision.HIGHEST,
                            preferred_element_type=jnp.float32)   # (1, tm) f32
        arow_ref[...] = rowsum.reshape(1, 1, tm)

    return kernel


def _vmem_capacity_bytes() -> int:
    """Physical VMEM per TensorCore (128 MiB v5e/v6e, 64 MiB v7x); conservative fallback."""
    try:
        info = pltpu.get_tpu_info()
    except Exception:
        return 64 * 1024 * 1024
    for attr in ("vmem_capacity_bytes", "vmem_size_bytes", "vmem_bytes"):
        v = getattr(info, attr, None)
        if v is None:
            continue
        try:
            v = int(v)
        except (TypeError, ValueError):
            continue
        if v > 0:
            return v
    return 64 * 1024 * 1024


def _choose_block_rows(m: int, n: int, itemsize: int) -> int:
    """Row-tile size: fits a generation-aware VMEM budget, prefers divisors of M
    (no ragged mask), then multiples of 128 (unmasked lane-dense writeback), and
    keeps >= 2 tiles for large M so the 'parallel' axis spans both v7x TCs."""
    sub = max(8, 32 // max(itemsize, 1))          # min sublane tile: 8 f32, 16 bf16
    vmem = _vmem_capacity_bytes()
    budget = (48 if vmem >= 100 * (1 << 20) else 24) * (1 << 20)
    cap = budget // (2 * 2 * n * max(itemsize, 1))   # 2 inputs x 2 pipeline buffers
    cap = max(sub, (cap // sub) * sub)
    if m <= sub:
        return m                                   # tiny: single full-extent tile
    if m < 256 and m <= cap:
        return m                                   # small: single full-extent tile
    if m >= 256:                                   # leave >= 2 tiles (v7x megacore)
        cap = min(cap, max(sub, (((m + 1) // 2) // sub) * sub))
    cap = min(cap, max(sub, (m // sub) * sub))
    best, best_key = 0, (-1, 0)
    for t in range(sub, cap + 1, sub):             # divisors of M first, prefer %128==0
        if m % t == 0:
            key = (1 if t % 128 == 0 else 0, t)
            if key > best_key:
                best_key, best = key, t
    if best:
        return best
    t128 = (cap // 128) * 128                      # no divisor: keep stores lane-dense
    return t128 if t128 >= 128 else cap


def weight_mae(y_true: jax.Array, y_pred: jax.Array, *,
               block_rows: int | None = None) -> jax.Array:
    """Pallas TPU implementation of the weight_mae forward pass. Returns a scalar."""
    assert y_true.shape == y_pred.shape
    assert y_true.ndim == 2 and y_true.shape[0] == y_true.shape[1], (
        "matmul(weights, |diff|) with same-shaped operands requires square matrices"
    )
    if y_pred.dtype != y_true.dtype:               # rare: promote once, outside the hot path
        ct = jnp.promote_types(y_true.dtype, y_pred.dtype)
        y_true, y_pred = y_true.astype(ct), y_pred.astype(ct)

    M, N = y_true.shape
    itemsize = jnp.dtype(y_true.dtype).itemsize
    sub = max(8, 32 // max(itemsize, 1))

    if block_rows is None:
        tm = _choose_block_rows(M, N, itemsize)
    else:
        tm = min(int(block_rows), M)
        if tm < M:
            tm = max(sub, (tm // sub) * sub)       # sublane multiple unless full dim
    G = pl.cdiv(M, tm)

    vmem = _vmem_capacity_bytes()
    vmem_limit = int(min(0.72 * vmem, 96 * 1024 * 1024))

    cost = pl.CostEstimate(
        flops=6 * M * N,
        transcendentals=0,
        bytes_accessed=2 * M * N * itemsize + (2 * G * N + G * tm) * 4,
    )

    # TODO(synk): for workloads with many small matrices, add a leading batch grid
    # axis (marked "parallel") so one pallas_call amortizes launch/per-step overhead
    # and feeds both v7x TensorCores.
    wcol, poscol, arow = pl.pallas_call(
        _make_weight_mae_kernel(M, tm, N),
        out_shape=(
            jax.ShapeDtypeStruct((G, 1, N), jnp.float32),    # per-tile colsum(W)
            jax.ShapeDtypeStruct((G, 1, N), jnp.float32),    # per-tile colsum(y_true > 0)
            jax.ShapeDtypeStruct((G, 1, tm), jnp.float32),   # per-tile rowsum(|diff|), lane-dense
        ),
        grid_spec=pltpu.PrefetchScalarGridSpec(
            num_scalar_prefetch=0,
            grid=(G,),
            in_specs=[
                pl.BlockSpec((tm, N), lambda i: (i, 0)),
                pl.BlockSpec((tm, N), lambda i: (i, 0)),
            ],
            out_specs=[
                pl.BlockSpec((1, 1, N), lambda i: (i, 0, 0)),
                pl.BlockSpec((1, 1, N), lambda i: (i, 0, 0)),
                pl.BlockSpec((1, 1, tm), lambda i: (i, 0, 0)),
            ],
        ),
        compiler_params=pltpu.CompilerParams(
            dimension_semantics=("parallel",),
            vmem_limit_bytes=vmem_limit,
        ),
        cost_estimate=cost,
    )(y_true, y_pred)

    # Tiny O(M) combine in the wrapper:
    #   sum(W @ A) = dot(colsum(W), rowsum(A));  loss = that / count(y_true > 0)
    colsum_w = jnp.sum(wcol[:, 0, :], axis=0)          # (N,)
    rowsum_a = arow.reshape(G * tm)[:M]                # (M,) == (N,); drops OOB garbage rows
    num_pos = jnp.sum(poscol.astype(jnp.int32))        # exact integer count
    total = jnp.dot(colsum_w, rowsum_a, precision=jax.lax.Precision.HIGHEST)
    return total / num_pos


def _weight_mae_ref(y_true, y_pred):
    yt = y_true.astype(jnp.float32)
    yp = y_pred.astype(jnp.float32)
    num = jnp.sum(y_true > 0).astype(jnp.float32)
    w = jnp.clip(yt, _CLAMP_LO, 1.0)
    prod = jnp.matmul(w, jnp.abs(yp - yt), precision=jax.lax.Precision.HIGHEST)
    return jnp.sum(prod) / num


if __name__ == "__main__":
    key = jax.random.PRNGKey(0)
    k1, k2 = jax.random.split(key)

    # Case 1: auto tile selection (single full-extent tile at this size).
    M = 128
    y_true = jax.random.uniform(k1, (M, M), dtype=jnp.float32)
    y_pred = jax.random.uniform(k2, (M, M), dtype=jnp.float32)
    out = jax.block_until_ready(weight_mae(y_true, y_pred))
    ref = _weight_mae_ref(y_true, y_pred)
    assert jnp.allclose(out, ref, rtol=1e-3, atol=1e-3), (out, ref)

    # Case 2: multi-tile pipelined grid, evenly divisible rows (G = 2).
    out2 = jax.block_until_ready(weight_mae(y_true, y_pred, block_rows=64))
    assert jnp.allclose(out2, ref, rtol=1e-3, atol=1e-3), (out2, ref)

    # Case 3: ragged last row tile (exercises the in-kernel column-sum mask).
    M3 = 96
    yt3 = jax.random.uniform(k1, (M3, M3), dtype=jnp.float32)
    yp3 = jax.random.uniform(k2, (M3, M3), dtype=jnp.float32)
    out3 = jax.block_until_ready(weight_mae(yt3, yp3, block_rows=64))
    ref3 = _weight_mae_ref(yt3, yp3)
    assert jnp.allclose(out3, ref3, rtol=1e-3, atol=1e-3), (out3, ref3)

    # Case 4: bf16 inputs stream bf16 end-to-end from HBM (no wrapper upcast).
    yt4 = y_true.astype(jnp.bfloat16)
    yp4 = y_pred.astype(jnp.bfloat16)
    out4 = jax.block_until_ready(weight_mae(yt4, yp4, block_rows=64))
    ref4 = _weight_mae_ref(yt4, yp4)
    assert jnp.allclose(out4, ref4, rtol=2e-2, atol=2e-2), (out4, ref4)

    print("KERNEL_OK")
</pallas_src>

<mosaic_0001>
module attributes {stable_mosaic.version = 11 : i64} {
  func.func @kernel(%arg0: i32, %arg1: memref<128x128xf32, #tpu.memory_space<vmem>>, %arg2: memref<128x128xf32, #tpu.memory_space<vmem>>, %arg3: memref<1x1x128xf32, #tpu.memory_space<vmem>>, %arg4: memref<1x1x128xf32, #tpu.memory_space<vmem>>, %arg5: memref<1x1x128xf32, #tpu.memory_space<vmem>>) attributes {dimension_semantics = [#tpu.dimension_semantics<parallel>], iteration_bounds = array<i64: 1>, scalar_prefetch = 0 : i64, scratch_operands = 0 : i64, tpu.core_type = #tpu.core_type<tc>, window_params = [{transform_indices = @transform_0, window_bounds = array<i64: 128, 128>}, {transform_indices = @transform_1, window_bounds = array<i64: 128, 128>}, {transform_indices = @transform_2, window_bounds = array<i64: 1, 1, 128>}, {transform_indices = @transform_3, window_bounds = array<i64: 1, 1, 128>}, {transform_indices = @transform_4, window_bounds = array<i64: 1, 1, 128>}]} {
    %c0 = arith.constant 0 : index
    %c0_0 = arith.constant 0 : index
    %0 = vector.load %arg1[%c0, %c0_0] : memref<128x128xf32, #tpu.memory_space<vmem>>, vector<128x128xf32>
    %c0_1 = arith.constant 0 : index
    %c0_2 = arith.constant 0 : index
    %1 = vector.load %arg2[%c0_1, %c0_2] : memref<128x128xf32, #tpu.memory_space<vmem>>, vector<128x128xf32>
    %cst = arith.constant 3.10099596E-4 : f32
    %cst_3 = arith.constant 1.000000e+00 : f32
    %2 = vector.broadcast %cst : f32 to vector<128x128xf32>
    %3 = arith.maximumf %2, %0 : vector<128x128xf32>
    %4 = vector.broadcast %cst_3 : f32 to vector<128x128xf32>
    %5 = arith.minimumf %4, %3 : vector<128x128xf32>
    %6 = arith.subf %1, %0 : vector<128x128xf32>
    %7 = math.absf %6 : vector<128x128xf32>
    %cst_4 = arith.constant 0.000000e+00 : f32
    %8 = vector.broadcast %cst_4 : f32 to vector<128x128xf32>
    %9 = arith.cmpf ogt, %0, %8 : vector<128x128xf32>
    %10 = arith.extui %9 : vector<128x128xi1> to vector<128x128xi32>
    %11 = arith.sitofp %10 : vector<128x128xi32> to vector<128x128xf32>
    %cst_5 = arith.constant dense<0.000000e+00> : vector<128xf32>
    %12 = vector.multi_reduction <add>, %5, %cst_5 [0] : vector<128x128xf32> to vector<128xf32>
    %13 = vector.shape_cast %12 : vector<128xf32> to vector<1x128xf32>
    %14 = vector.shape_cast %13 : vector<1x128xf32> to vector<1x1x128xf32>
    %c0_6 = arith.constant 0 : index
    %c0_7 = arith.constant 0 : index
    %c0_8 = arith.constant 0 : index
    %15 = vector.load %arg3[%c0_6, %c0_7, %c0_8] : memref<1x1x128xf32, #tpu.memory_space<vmem>>, vector<1x1x128xf32>
    tpu.vector_store %arg3[%c0_6, %c0_7, %c0_8], %14 {strides = array<i32>} : memref<1x1x128xf32, #tpu.memory_space<vmem>>, vector<1x1x128xf32>,
    %cst_9 = arith.constant dense<0.000000e+00> : vector<128xf32>
    %16 = vector.multi_reduction <add>, %11, %cst_9 [0] : vector<128x128xf32> to vector<128xf32>
    %17 = vector.shape_cast %16 : vector<128xf32> to vector<1x128xf32>
    %18 = vector.shape_cast %17 : vector<1x128xf32> to vector<1x1x128xf32>
    %c0_10 = arith.constant 0 : index
    %c0_11 = arith.constant 0 : index
    %c0_12 = arith.constant 0 : index
    %19 = vector.load %arg4[%c0_10, %c0_11, %c0_12] : memref<1x1x128xf32, #tpu.memory_space<vmem>>, vector<1x1x128xf32>
    tpu.vector_store %arg4[%c0_10, %c0_11, %c0_12], %18 {strides = array<i32>} : memref<1x1x128xf32, #tpu.memory_space<vmem>>, vector<1x1x128xf32>,
    %cst_13 = arith.constant 1.000000e+00 : f32
    %20 = vector.broadcast %cst_13 : f32 to vector<1x128xf32>
    "tpu.trace_start"() <{level = 10 : i32, message = "qd,kd->qk"}> : () -> ()
    %cst_14 = arith.constant dense<0.000000e+00> : vector<1x128xf32>
    %21 = tpu.matmul %20, %7, %cst_14 {dimension_numbers = #tpu.dot_dimension_numbers<[1], [1], [0], [0], [0, 0, 1, 0], [], []>, precision = #tpu.contract_precision<fp32>} : vector<1x128xf32>, vector<128x128xf32>, vector<1x128xf32> -> vector<1x128xf32>
    "tpu.trace_stop"() : () -> ()
    %22 = vector.shape_cast %21 : vector<1x128xf32> to vector<1x1x128xf32>
    %c0_15 = arith.constant 0 : index
    %c0_16 = arith.constant 0 : index
    %c0_17 = arith.constant 0 : index
    %23 = vector.load %arg5[%c0_15, %c0_16, %c0_17] : memref<1x1x128xf32, #tpu.memory_space<vmem>>, vector<1x1x128xf32>
    tpu.vector_store %arg5[%c0_15, %c0_16, %c0_17], %22 {strides = array<i32>} : memref<1x1x128xf32, #tpu.memory_space<vmem>>, vector<1x1x128xf32>,
    return
  }
  func.func @transform_0(%arg0: i32) -> (i32, i32) {
    %c0_i32 = arith.constant 0 : i32
    %c0_i32_0 = arith.constant 0 : i32
    return %arg0, %c0_i32 : i32, i32
  }
  func.func @transform_1(%arg0: i32) -> (i32, i32) {
    %c0_i32 = arith.constant 0 : i32
    %c0_i32_0 = arith.constant 0 : i32
    return %arg0, %c0_i32 : i32, i32
  }
  func.func @transform_2(%arg0: i32) -> (i32, i32, i32) {
    %c0_i32 = arith.constant 0 : i32
    %c0_i32_0 = arith.constant 0 : i32
    %c0_i32_1 = arith.constant 0 : i32
    return %arg0, %c0_i32, %c0_i32_0 : i32, i32, i32
  }
  func.func @transform_3(%arg0: i32) -> (i32, i32, i32) {
    %c0_i32 = arith.constant 0 : i32
    %c0_i32_0 = arith.constant 0 : i32
    %c0_i32_1 = arith.constant 0 : i32
    return %arg0, %c0_i32, %c0_i32_0 : i32, i32, i32
  }
  func.func @transform_4(%arg0: i32) -> (i32, i32, i32) {
    %c0_i32 = arith.constant 0 : i32
    %c0_i32_0 = arith.constant 0 : i32
    %c0_i32_1 = arith.constant 0 : i32
    return %arg0, %c0_i32, %c0_i32_0 : i32, i32, i32
  }
}

</mosaic_0001>

<bundles_post_ra>
// kernel: tpu_custom_call.1
= control target key start
LH: loop header
LB: loop body
LE: loop exit
PB: predicated region body
PF: predicated region fallthrough
CT: control target
= control target key end

     0   :  { %10 = vsyncpa [#allocation3], 0  ;;  %s1922_s0 = inlined_call_operand.hbm [shape: f32[128,128], index: 0, kind: input, shape index: {}]   ;;  %s1923_s1 = inlined_call_operand.hbm [shape: f32[128,128], index: 1, kind: input, shape index: {}]   ;;  %s1924_s2 = inlined_call_operand.hbm [shape: f32[1,1,128], index: 2, kind: output, shape index: {0}]   ;;  %s1925_s3 = inlined_call_operand.hbm [shape: f32[1,1,128], index: 3, kind: output, shape index: {1}]   ;;  %s1926_s4 = inlined_call_operand.hbm [shape: f32[1,1,128], index: 4, kind: output, shape index: {2}]  }
   0x1   :  { %11 = vsyncpa [#allocation6], 0 }
   0x2   :  { %12 = vsyncpa [#allocation4], 0 }
   0x3   :  { %13 = vsyncpa [#allocation9], 0  ;;  %s1514_s15 = smov [#allocation2]   ;;  %s1396_s19 = scalar_lea.hbm %s1922_s0, 2048 }
   0x4   :  { %s19_s16 = sshll.u32 %s1514_s15, 4  ;;  %p1397_p0 = scmp.ne.s32.totalorder %s1922_s0, %s1396_s19  ;;  %s20_s16 = int_to_ptr.vmem [resolvable:$true] %s19_s16 }
   0x5   :  { %p1400_p1 = scmp.lt.u32.totalorder %s1396_s19, %s1922_s0 }
   0x7   :  { %p1402_p2 = pnand %p1400_p1, %p1397_p0 }
   0x9   :  { %1405 = shalt.err (!%p1402_p2)
}
   0xa   :  { %s1406_s24 = scalar_lea.vmem %s20_s16, 2048  ;;  %p1411_p4 = scmp.lt.s32.totalorder %s20_s16, %s20_s16 }
   0xb   :  { %p1407_p3 = scmp.ne.s32.totalorder %s20_s16, %s1406_s24  ;;  %p1412_p5 = scmp.lt.s32.totalorder %s1406_s24, %s1406_s24 }
   0xd   :  { %p1413_p6 = por %p1412_p5, %p1411_p4 }
   0xf   :  { %p1414_p7 = pnand %p1413_p6, %p1407_p3 }
  0x11   :  { %1417 = shalt.err (!%p1414_p7)
}
  0x12   :  { %s1515_s25 = smov 128   ;;  %s1516_s26 = smov 8  }
  0x13   :  { %25 = dma.hbm_to_vmem [thread:$0]  %s1922_s0, 2048, %s20_s16, [#allocation3], %s1515_s25, %s1515_s25, %s1516_s26  }
  0x14   :  { %s1517_s29 = smov [#allocation5]   ;;  %s1418_s7 = scalar_lea.hbm %s1923_s1, 2048 }
  0x15   :  { %s31_s30 = sshll.u32 %s1517_s29, 4  ;;  %p1419_p8 = scmp.ne.s32.totalorder %s1923_s1, %s1418_s7  ;;  %s32_s30 = int_to_ptr.vmem [resolvable:$true] %s31_s30 }
  0x16   :  { %p1422_p9 = scmp.lt.u32.totalorder %s1418_s7, %s1923_s1 }
  0x18   :  { %p1424_p10 = pnand %p1422_p9, %p1419_p8 }
  0x1a   :  { %1427 = shalt.err (!%p1424_p10)
}
  0x1b   :  { %s1428_s12 = scalar_lea.vmem %s32_s30, 2048  ;;  %p1433_p12 = scmp.lt.s32.totalorder %s32_s30, %s32_s30 }
  0x1c   :  { %p1429_p11 = scmp.ne.s32.totalorder %s32_s30, %s1428_s12  ;;  %p1434_p13 = scmp.lt.s32.totalorder %s1428_s12, %s1428_s12 }
  0x1e   :  { %p1435_p0 = por %p1434_p13, %p1433_p12 }
  0x20   :  { %p1436_p1 = pnand %p1435_p0, %p1429_p11 }
  0x22   :  { %1439 = shalt.err (!%p1436_p1)
}
  0x23   :  { %37 = dma.hbm_to_vmem [thread:$0]  %s1923_s1, 2048, %s32_s30, [#allocation6], %s1515_s25, %s1515_s25, %s1516_s26  }
  0x24   :  { %1506 = dma.done.wait [#allocation3], 2048  }
  0x25   :  { %1507 = vsyncadd [#allocation3], 4294965248 }
  0x26   :  { %1508 = dma.done.wait [#allocation6], 2048  }
  0x27   :  { %1509 = vsyncadd [#allocation6], 4294965248  ;;  %v1518_v0 = vmov 0.0|0.0   ;;  %vm1519_vm0 = vmmov 0   ;;  %v1520_v1 = vmov 0.0   ;;  %v44_v2 = vld [vmem:[#allocation2] sm:$0xff] }
  0x28   :  { %1232 = vmatprep.subr.bf16.mxu1 %v1518_v0  ;;  %1304 = vmatprep.subr.bf16.mxu0 %v1518_v0  ;;  %v45_v3 = vld [vmem:[#allocation2 + $0x8] sm:$0xff]  ;;  %v60_v4 = vld [vmem:[#allocation5] sm:$0xff]  ;;  %v76_v6 = vmax.f32 %v44_v2, 0.0003100996  ;;  %vm140_vm1 = vcmp.gt.f32.partialorder %v44_v2, 0.0  ;;  %v46_v11 = vld [vmem:[#allocation2 + $0x10] sm:$0xff] }
  0x29   :  { %1054 = vmatprep.mubr.msk.f32.mxu1 %vm1519_vm0, %v1520_v1  ;;  %1159 = vmatprep.mubr.msk.f32.mxu0 %vm1519_vm0, %v1520_v1  ;;  %v61_v5 = vld [vmem:[#allocation5 + $0x8] sm:$0xff]  ;;  %v77_v7 = vmax.f32 %v45_v3, 0.0003100996  ;;  %v108_v8 = vsub.f32 %v60_v4, %v44_v2  ;;  %vm141_vm2 = vcmp.gt.f32.partialorder %v45_v3, 0.0  ;;  %v904_v10 = vsel %vm140_vm1, 1.0, %v1520_v1  ;;  %v47_v12 = vld [vmem:[#allocation2 + $0x18] sm:$0xff] }
  0x2a   :  { %v109_v9 = vsub.f32 %v61_v5, %v45_v3  ;;  %v62_v13 = vld [vmem:[#allocation5 + $0x10] sm:$0xff]  ;;  %v92_v14 = vmin.f32 %v76_v6, 1.0  ;;  %v905_v17 = vsel %vm141_vm2, 1.0, %v1520_v1  ;;  %v63_v18 = vld [vmem:[#allocation5 + $0x18] sm:$0xff]  ;;  %v78_v21 = vmax.f32 %v46_v11, 0.0003100996 }
  0x2b   :  { %v93_v15 = vmin.f32 %v77_v7, 1.0  ;;  %v1581_v16 = vand.u32 2147483647, %v108_v8  ;;  %v210_v20 = vadd.f32 %v905_v17, %v904_v10  ;;  %v79_v22 = vmax.f32 %v47_v12, 0.0003100996  ;;  %v48_v27 = vld [vmem:[#allocation2 + $0x20] sm:$0xff] }
  0x2c   :  { %v1584_v19 = vand.u32 2147483647, %v109_v9  ;;  %v110_v25 = vsub.f32 %v62_v13, %v46_v11  ;;  %v111_v26 = vsub.f32 %v63_v18, %v47_v12  ;;  %v94_v29 = vmin.f32 %v78_v21, 1.0  ;;  %v49_v31 = vld [vmem:[#allocation2 + $0x28] sm:$0xff]  ;;  %v64_v32 = vld [vmem:[#allocation5 + $0x20] sm:$0xff]  ;;  %v50_v52 = vld [vmem:[#allocation2 + $0x30] sm:$0xff] }
  0x2d   :  { %v188_v23 = vadd.f32 %v93_v15, %v92_v14  ;;  %v233_v24 = vand.u32 4294901760, %v1581_v16  ;;  %v95_v30 = vmin.f32 %v79_v22, 1.0  ;;  %vm142_vm3 = vcmp.gt.f32.partialorder %v46_v11, 0.0  ;;  %v65_v35 = vld [vmem:[#allocation5 + $0x28] sm:$0xff]  ;;  %v51_v59 = vld [vmem:[#allocation2 + $0x38] sm:$0xff]  ;;  %v66_v60 = vld [vmem:[#allocation5 + $0x30] sm:$0xff] }
  0x2e   :  { %v236_v28 = vand.u32 4294901760, %v1584_v19  ;;  %v1588_v33 = vand.u32 2147483647, %v110_v25  ;;  %v1590_v34 = vand.u32 2147483647, %v111_v26  ;;  %vm143_vm4 = vcmp.gt.f32.partialorder %v47_v12, 0.0 }
  0x2f   :  { %v906_v37 = vsel %vm142_vm3, 1.0, %v1520_v1  ;;  %v907_v38 = vsel %vm143_vm4, 1.0, %v1520_v1  ;;  %v189_v39 = vadd.f32 %v188_v23, %v94_v29  ;;  %v80_v43 = vmax.f32 %v48_v27, 0.0003100996  ;;  %v67_v61 = vld [vmem:[#allocation5 + $0x38] sm:$0xff]  ;;  %v52_v10 = vld [vmem:[#allocation2 + $0x40] sm:$0xff] }
  0x30   :  { %v1596_v36 = vpack.c.bf16 %v236_v28, %v233_v24  ;;  %v211_v40 = vadd.f32 %v906_v37, %v210_v20  ;;  %v239_v41 = vand.u32 4294901760, %v1588_v33  ;;  %v242_v42 = vand.u32 4294901760, %v1590_v34  ;;  %v53_v14 = vld [vmem:[#allocation2 + $0x48] sm:$0xff]  ;;  %v68_v18 = vld [vmem:[#allocation5 + $0x40] sm:$0xff]  ;;  %s1522_s1 = smov [#allocation8]   ;;  %s1523_s15 = smov [#allocation7]  }
  0x31   :  { %v81_v44 = vmax.f32 %v49_v31, 0.0003100996  ;;  %v112_v45 = vsub.f32 %v64_v32, %v48_v27  ;;  %v113_v46 = vsub.f32 %v65_v35, %v49_v31  ;;  %v190_v47 = vadd.f32 %v189_v39, %v95_v30  ;;  %v69_v29 = vld [vmem:[#allocation5 + $0x48] sm:$0xff]  ;;  %v54_v32 = vld [vmem:[#allocation2 + $0x50] sm:$0xff]  ;;  %s877_s14 = sshll.u32 %s1522_s1, 4  ;;  %s867_s16 = sshll.u32 %s1523_s15, 4  ;;  %s878_s14 = int_to_ptr.vmem [resolvable:$true] %s877_s14  ;;  %s868_s16 = int_to_ptr.vmem [resolvable:$true] %s867_s16 }
  0x32   :  { %1234 = vmatpush3.bf16.xpose.msra.mxu1 %v1596_v36  ;;  %1306 = vmatpush3.bf16.xpose.msra.mxu0 %v1596_v36  ;;  %v212_v48 = vadd.f32 %v907_v38, %v211_v40  ;;  %vm144_vm5 = vcmp.gt.f32.partialorder %v48_v27, 0.0  ;;  %v1610_v49 = vpack.c.bf16 %v242_v42, %v239_v41  ;;  %v96_v50 = vmin.f32 %v80_v43, 1.0  ;;  %s1440_s17 = scalar_lea.vmem %s878_s14, 16  ;;  %s1444_s18 = scalar_lea.vmem %s878_s14, 32 }
  0x33   :  { %1235 = vmatprep.subr.bf16.mxu1 %v1518_v0  ;;  %1307 = vmatprep.subr.bf16.mxu0 %v1518_v0  ;;  %v97_v51 = vmin.f32 %v81_v44, 1.0  ;;  %v1612_v53 = vand.u32 2147483647, %v112_v45  ;;  %v1614_v54 = vand.u32 2147483647, %v113_v46  ;;  %vm145_vm6 = vcmp.gt.f32.partialorder %v49_v31, 0.0  ;;  %p1441_p2 = scmp.ne.s32.totalorder %s878_s14, %s1440_s17  ;;  %p1445_p3 = scmp.lt.s32.totalorder %s878_s14, %s878_s14 }
  0x34   :  { %v908_v55 = vsel %vm144_vm5, 1.0, %v1520_v1  ;;  %v909_v56 = vsel %vm145_vm6, 1.0, %v1520_v1  ;;  %v191_v57 = vadd.f32 %v190_v47, %v96_v50  ;;  %v82_v62 = vmax.f32 %v50_v52, 0.0003100996  ;;  %v55_v45 = vld [vmem:[#allocation2 + $0x58] sm:$0xff]  ;;  %p1446_p4 = scmp.lt.s32.totalorder %s1444_s18, %s1440_s17 }
  0x35   :  { %v213_v58 = vadd.f32 %v908_v55, %v212_v48  ;;  %v83_v63 = vmax.f32 %v51_v59, 0.0003100996  ;;  %v114_v6 = vsub.f32 %v66_v60, %v50_v52  ;;  %v115_v7 = vsub.f32 %v67_v61, %v51_v59 }
  0x36   :  { %v192_v2 = vadd.f32 %v191_v57, %v97_v51  ;;  %v98_v4 = vmin.f32 %v82_v62, 1.0  ;;  %v245_v8 = vand.u32 4294901760, %v1612_v53  ;;  %v248_v9 = vand.u32 4294901760, %v1614_v54  ;;  %p1447_p5 = por %p1446_p4, %p1445_p3 }
  0x37   :  { %v214_v3 = vadd.f32 %v909_v56, %v213_v58  ;;  %v99_v5 = vmin.f32 %v83_v63, 1.0  ;;  %vm146_vm7 = vcmp.gt.f32.partialorder %v50_v52, 0.0  ;;  %vm147_vm8 = vcmp.gt.f32.partialorder %v51_v59, 0.0  ;;  %v56_v56 = vld [vmem:[#allocation2 + $0x60] sm:$0xff] }
  0x38   :  { %v910_v11 = vsel %vm146_vm7, 1.0, %v1520_v1  ;;  %v911_v12 = vsel %vm147_vm8, 1.0, %v1520_v1  ;;  %v193_v13 = vadd.f32 %v192_v2, %v98_v4  ;;  %v84_v15 = vmax.f32 %v52_v10, 0.0003100996  ;;  %v70_v2 = vld [vmem:[#allocation5 + $0x50] sm:$0xff]  ;;  %p1448_p6 = pnand %p1447_p5, %p1441_p2 }
  0x39   :  { %v215_v17 = vadd.f32 %v910_v11, %v214_v3  ;;  %v85_v20 = vmax.f32 %v53_v14, 0.0003100996  ;;  %v1626_v21 = vand.u32 2147483647, %v114_v6  ;;  %v1628_v22 = vand.u32 2147483647, %v115_v7 }
  0x3a   :  { %1237 = vmatpush3.bf16.xpose.msra.mxu1 %v1610_v49  ;;  %1309 = vmatpush3.bf16.xpose.msra.mxu0 %v1610_v49  ;;  %v194_v23 = vadd.f32 %v193_v13, %v99_v5  ;;  %v100_v25 = vmin.f32 %v84_v15, 1.0  ;;  %v1634_v26 = vpack.c.bf16 %v248_v9, %v245_v8  ;;  %v116_v31 = vsub.f32 %v68_v18, %v52_v10  ;;  %v71_v3 = vld [vmem:[#allocation5 + $0x58] sm:$0xff] }
  0x3b   :  { %1238 = vmatprep.subr.bf16.mxu1 %v1518_v0  ;;  %1310 = vmatprep.subr.bf16.mxu0 %v1518_v0  ;;  %v216_v27 = vadd.f32 %v911_v12, %v215_v17  ;;  %v101_v30 = vmin.f32 %v85_v20, 1.0  ;;  %vm148_vm9 = vcmp.gt.f32.partialorder %v52_v10, 0.0  ;;  %vm149_vm10 = vcmp.gt.f32.partialorder %v53_v14, 0.0 }
  0x3c   :  { %v912_v35 = vsel %vm148_vm9, 1.0, %v1520_v1  ;;  %v195_v37 = vadd.f32 %v194_v23, %v100_v25  ;;  %v86_v38 = vmax.f32 %v54_v32, 0.0003100996  ;;  %v251_v39 = vand.u32 4294901760, %v1626_v21  ;;  %v1666_v23 = vld [vmem:[#allocation2 + $0x68] sm:$0xff]  ;;  %v72_v25 = vld [vmem:[#allocation5 + $0x60] sm:$0xff] }
  0x3d   :  { %v254_v40 = vand.u32 4294901760, %v1628_v22  ;;  %v913_v43 = vsel %vm149_vm10, 1.0, %v1520_v1  ;;  %v217_v44 = vadd.f32 %v912_v35, %v216_v27  ;;  %v117_v46 = vsub.f32 %v69_v29, %v53_v14  ;;  %v73_v27 = vld [vmem:[#allocation5 + $0x68] sm:$0xff]  ;;  %v1673_v35 = vld [vmem:[#allocation2 + $0x70] sm:$0xff] }
  0x3e   :  { %v196_v47 = vadd.f32 %v195_v37, %v101_v30  ;;  %v87_v48 = vmax.f32 %v55_v45, 0.0003100996  ;;  %v102_v50 = vmin.f32 %v86_v38, 1.0  ;;  %vm150_vm11 = vcmp.gt.f32.partialorder %v54_v32, 0.0  ;;  %v74_v37 = vld [vmem:[#allocation5 + $0x70] sm:$0xff]  ;;  %v1675_v38 = vld [vmem:[#allocation2 + $0x78] sm:$0xff] }
  0x3f   :  { %v218_v51 = vadd.f32 %v913_v43, %v217_v44  ;;  %v1644_v52 = vand.u32 2147483647, %v116_v31  ;;  %vm151_vm12 = vcmp.gt.f32.partialorder %v55_v45, 0.0  ;;  %v914_v57 = vsel %vm150_vm11, 1.0, %v1520_v1  ;;  %v75_v43 = vld [vmem:[#allocation5 + $0x78] sm:$0xff] }
  0x40   :  { %v103_v55 = vmin.f32 %v87_v48, 1.0  ;;  %v197_v58 = vadd.f32 %v196_v47, %v102_v50  ;;  %v88_v59 = vmax.f32 %v56_v56, 0.0003100996  ;;  %v1651_v60 = vpack.c.bf16 %v254_v40, %v251_v39 }
  0x41   :  { %v133_v61 = vand.u32 2147483647, %v117_v46  ;;  %v915_v62 = vsel %vm151_vm12, 1.0, %v1520_v1  ;;  %v219_v63 = vadd.f32 %v914_v57, %v218_v51  ;;  %v257_v7 = vand.u32 4294901760, %v1644_v52 }
  0x42   :  { %1240 = vmatpush3.bf16.xpose.msra.mxu1 %v1634_v26  ;;  %1312 = vmatpush3.bf16.xpose.msra.mxu0 %v1634_v26  ;;  %v198_v4 = vadd.f32 %v197_v58, %v103_v55  ;;  %v104_v5 = vmin.f32 %v88_v59, 1.0  ;;  %vm152_vm13 = vcmp.gt.f32.partialorder %v56_v56, 0.0  ;;  %v118_v11 = vsub.f32 %v70_v2, %v54_v32 }
  0x43   :  { %1241 = vmatprep.subr.bf16.mxu1 %v1518_v0  ;;  %1313 = vmatprep.subr.bf16.mxu0 %v1518_v0  ;;  %v220_v6 = vadd.f32 %v915_v62, %v219_v63  ;;  %v260_v10 = vand.u32 4294901760, %v133_v61  ;;  %v119_v12 = vsub.f32 %v71_v3, %v55_v45  ;;  %v916_v13 = vsel %vm152_vm13, 1.0, %v1520_v1 }
  0x44   :  { %v1660_v14 = vadd.f32 %v198_v4, %v104_v5  ;;  %v134_v18 = vand.u32 2147483647, %v118_v11  ;;  %v120_v31 = vsub.f32 %v72_v25, %v56_v56  ;;  %v121_v32 = vsub.f32 %v73_v27, %v1666_v23 }
  0x45   :  { %v1662_v15 = vadd.f32 %v916_v13, %v220_v6  ;;  %v1664_v17 = vpack.c.bf16 %v260_v10, %v257_v7  ;;  %v135_v20 = vand.u32 2147483647, %v119_v12  ;;  %v122_v47 = vsub.f32 %v74_v37, %v1673_v35 }
  0x46   :  { %v263_v29 = vand.u32 4294901760, %v134_v18  ;;  %v136_v45 = vand.u32 2147483647, %v120_v31  ;;  %v137_v46 = vand.u32 2147483647, %v121_v32  ;;  %v123_v48 = vsub.f32 %v75_v43, %v1675_v38 }
  0x47   :  { %v266_v30 = vand.u32 4294901760, %v135_v20  ;;  %v1684_v50 = vsub.f32 %v1581_v16, %v233_v24  ;;  %v138_v56 = vand.u32 2147483647, %v122_v47  ;;  %v1691_v57 = vsub.f32 %v1584_v19, %v236_v28 }
  0x48   :  { %v269_v51 = vand.u32 4294901760, %v136_v45  ;;  %v272_v55 = vand.u32 4294901760, %v137_v46  ;;  %v1696_v58 = vsub.f32 %v1588_v33, %v239_v41  ;;  %v1701_v16 = vsub.f32 %v1590_v34, %v242_v42 }
  0x49   :  { %v1677_v44 = vpack.c.bf16 %v266_v30, %v263_v29  ;;  %v139_v24 = vand.u32 2147483647, %v123_v48  ;;  %v1708_v19 = vsub.f32 %v1612_v53, %v245_v8  ;;  %v1713_v28 = vsub.f32 %v1614_v54, %v248_v9 }
  0x4a   :  { %1243 = vmatpush3.bf16.xpose.msra.mxu1 %v1651_v60  ;;  %1315 = vmatpush3.bf16.xpose.msra.mxu0 %v1651_v60  ;;  %v1718_v33 = vsub.f32 %v1626_v21, %v251_v39  ;;  %v1723_v34 = vsub.f32 %v1628_v22, %v254_v40  ;;  %v1726_v41 = vsub.f32 %v1644_v52, %v257_v7  ;;  %v275_v39 = vand.u32 4294901760, %v138_v56 }
  0x4b   :  { %1244 = vmatprep.subr.bf16.mxu1 %v1518_v0  ;;  %1316 = vmatprep.subr.bf16.mxu0 %v1518_v0  ;;  %v1728_v42 = vsub.f32 %v133_v61, %v260_v10  ;;  %v1730_v53 = vsub.f32 %v134_v18, %v263_v29  ;;  %v1732_v8 = vsub.f32 %v135_v20, %v266_v30  ;;  %v278_v59 = vand.u32 4294901760, %v139_v24 }
  0x4c   :  { %v1734_v54 = vpack.c.bf16 %v272_v55, %v269_v51  ;;  %v1736_v9 = vsub.f32 %v136_v45, %v269_v51  ;;  %v1738_v21 = vsub.f32 %v137_v46, %v272_v55  ;;  %v1281_v22 = vpack.c.bf16 %v1691_v57, %v1684_v50 }
  0x4d   :  { %v1284_v40 = vpack.c.bf16 %v1701_v16, %v1696_v58  ;;  %v1287_v52 = vpack.c.bf16 %v1713_v28, %v1708_v19  ;;  %v1290_v61 = vpack.c.bf16 %v1723_v34, %v1718_v33  ;;  %v1293_v62 = vpack.c.bf16 %v1728_v42, %v1726_v41 }
  0x4e   :  { %v1750_v63 = vsub.f32 %v138_v56, %v275_v39  ;;  %v1752_v2 = vsub.f32 %v139_v24, %v278_v59  ;;  %v1296_v3 = vpack.c.bf16 %v1732_v8, %v1730_v53  ;;  %v1299_v4 = vpack.c.bf16 %v1738_v21, %v1736_v9 }
  0x4f   :  { %v321_v5 = vand.u32 4294901760, %v1684_v50  ;;  %v328_v6 = vand.u32 4294901760, %v1691_v57  ;;  %v1766_v10 = vpack.c.bf16 %v278_v59, %v275_v39  ;;  %v335_v20 = vand.u32 4294901760, %v1696_v58 }
  0x50   :  { %v1302_v7 = vpack.c.bf16 %v1752_v2, %v1750_v63  ;;  %v342_v25 = vand.u32 4294901760, %v1701_v16  ;;  %v349_v43 = vand.u32 4294901760, %v1708_v19  ;;  %v356_v45 = vand.u32 4294901760, %v1713_v28 }
  0x51   :  { %v322_v11 = vsub.f32 %v1684_v50, %v321_v5  ;;  %v329_v12 = vsub.f32 %v1691_v57, %v328_v6  ;;  %v1329_v29 = vpack.c.bf16 %v328_v6, %v321_v5  ;;  %v336_v30 = vsub.f32 %v1696_v58, %v335_v20 }
  0x52   :  { %1246 = vmatpush3.bf16.xpose.msra.mxu1 %v1664_v17  ;;  %1318 = vmatpush3.bf16.xpose.msra.mxu0 %v1664_v17  ;;  %v343_v31 = vsub.f32 %v1701_v16, %v342_v25  ;;  %v1332_v47 = vpack.c.bf16 %v342_v25, %v335_v20  ;;  %v350_v48 = vsub.f32 %v1708_v19, %v349_v43  ;;  %v363_v24 = vand.u32 4294901760, %v1718_v33 }
  0x53   :  { %1247 = vmatprep.subr.bf16.mxu1 %v1518_v0  ;;  %1319 = vmatprep.subr.bf16.mxu0 %v1518_v0  ;;  %v323_v13 = vand.u32 4294901760, %v322_v11  ;;  %v330_v18 = vand.u32 4294901760, %v329_v12  ;;  %v337_v32 = vand.u32 4294901760, %v336_v30  ;;  %v357_v51 = vsub.f32 %v1713_v28, %v356_v45 }
  0x54   :  { %v344_v37 = vand.u32 4294901760, %v343_v31  ;;  %v351_v55 = vand.u32 4294901760, %v350_v48  ;;  %v370_v39 = vand.u32 4294901760, %v1723_v34  ;;  %v1335_v5 = vpack.c.bf16 %v356_v45, %v349_v43 }
  0x55   :  { %v1257_v27 = vpack.c.bf16 %v330_v18, %v323_v13  ;;  %v358_v56 = vand.u32 4294901760, %v357_v51  ;;  %v364_v6 = vsub.f32 %v1718_v33, %v363_v24  ;;  %v377_v18 = vand.u32 4294901760, %v1726_v41 }
  0x56   :  { %v1260_v46 = vpack.c.bf16 %v344_v37, %v337_v32  ;;  %v371_v11 = vsub.f32 %v1723_v34, %v370_v39  ;;  %v384_v20 = vand.u32 4294901760, %v1728_v42  ;;  %v391_v37 = vand.u32 4294901760, %v1730_v53 }
  0x57   :  { %v1263_v59 = vpack.c.bf16 %v358_v56, %v351_v55  ;;  %v365_v12 = vand.u32 4294901760, %v364_v6  ;;  %v398_v43 = vand.u32 4294901760, %v1732_v8  ;;  %v405_v56 = vand.u32 4294901760, %v1736_v9 }
  0x58   :  { %v372_v13 = vand.u32 4294901760, %v371_v11  ;;  %v385_v30 = vsub.f32 %v1728_v42, %v384_v20  ;;  %vm153_vm14 = vcmp.gt.f32.partialorder %v1666_v23, 0.0  ;;  %vm154_vm15 = vcmp.gt.f32.partialorder %v1673_v35, 0.0 }
  0x59   :  { %v399_v48 = vsub.f32 %v1732_v8, %v398_v43  ;;  %v91_v50 = vmax.f32 %v1675_v38, 0.0003100996 }
  0x5a   :  { %1249 = vmatpush3.bf16.xpose.msra.mxu1 %v1677_v44  ;;  %1321 = vmatpush3.bf16.xpose.msra.mxu0 %v1677_v44  ;;  %v1266_v25 = vpack.c.bf16 %v372_v13, %v365_v12  ;;  %v386_v32 = vand.u32 4294901760, %v385_v30  ;;  %v419_v13 = vand.u32 4294901760, %v1750_v63 }
  0x5b   :  { %1250 = vmatprep.subr.bf16.mxu1 %v1518_v0  ;;  %1322 = vmatprep.subr.bf16.mxu0 %v1518_v0  ;;  %v400_v55 = vand.u32 4294901760, %v399_v48  ;;  %v107_v16 = vmin.f32 %v91_v50, 1.0 }
  0x62   :  { %1252 = vmatpush3.bf16.xpose.msra.mxu1 %v1734_v54  ;;  %1324 = vmatpush3.bf16.xpose.msra.mxu0 %v1734_v54 }
  0x63   :  { %1253 = vmatprep.subr.bf16.mxu1 %v1518_v0  ;;  %1325 = vmatprep.subr.bf16.mxu0 %v1518_v0 }
  0x6a   :  { %1255 = vmatpush3.bf16.xpose.msra.mxu1 %v1766_v10  ;;  %1327 = vmatpush3.bf16.xpose.msra.mxu0 %v1766_v10 }
  0x6b   :  { %1256 = vmatprep.subr.bf16.mxu1 %v1518_v0  ;;  %1328 = vmatprep.subr.bf16.mxu0 %v1518_v0 }
  0x71   :  { %1055 = vmatmul.mubr.f32.vlgmr.msra.gmra.mrb[0].mxu1 %v1520_v1  ;;  %1160 = vmatmul.mubr.f32.vlgmr.msra.gmra.mrb[0].mxu0 %v1520_v1 }
  0x72   :  { %1258 = vmatpush3.bf16.xpose.msra.mxu1 %v1257_v27  ;;  %1330 = vmatpush3.bf16.xpose.msra.mxu0 %v1329_v29  ;;  %v1338_v27 = vpack.c.bf16 %v370_v39, %v363_v24  ;;  %v378_v29 = vsub.f32 %v1726_v41, %v377_v18  ;;  %v412_v24 = vand.u32 4294901760, %v1738_v21 }
  0x73   :  { %1259 = vmatprep.subr.bf16.mxu1 %v1518_v0  ;;  %1331 = vmatprep.subr.bf16.mxu0 %v1518_v0 }
  0x74   :  { %1089 = vmatprep.mubr.msk.f32.mxu1 %vm1519_vm0, %v1520_v1  ;;  %1194 = vmatprep.mubr.msk.f32.mxu0 %vm1519_vm0, %v1520_v1  ;;  %v379_v31 = vand.u32 4294901760, %v378_v29  ;;  %v413_v6 = vsub.f32 %v1738_v21, %v412_v24 }
  0x76   :  { %v1269_v45 = vpack.c.bf16 %v386_v32, %v379_v31  ;;  %v414_v12 = vand.u32 4294901760, %v413_v6 }
  0x7a   :  { %1261 = vmatpush3.bf16.xpose.msra.mxu1 %v1260_v46  ;;  %1333 = vmatpush3.bf16.xpose.msra.mxu0 %v1332_v47  ;;  %v1341_v46 = vpack.c.bf16 %v384_v20, %v377_v18  ;;  %v392_v47 = vsub.f32 %v1730_v53, %v391_v37  ;;  %v426_v18 = vand.u32 4294901760, %v1752_v2 }
  0x7b   :  { %1262 = vmatprep.subr.bf16.mxu1 %v1518_v0  ;;  %1334 = vmatprep.subr.bf16.mxu0 %v1518_v0 }
  0x7c   :  { %v393_v51 = vand.u32 4294901760, %v392_v47  ;;  %v427_v29 = vsub.f32 %v1752_v2, %v426_v18 }
  0x7e   :  { %v1272_v39 = vpack.c.bf16 %v400_v55, %v393_v51  ;;  %v428_v31 = vand.u32 4294901760, %v427_v29 }
  0x82   :  { %1264 = vmatpush3.bf16.xpose.msra.mxu1 %v1263_v59  ;;  %1336 = vmatpush3.bf16.xpose.msra.mxu0 %v1335_v5  ;;  %v1344_v59 = vpack.c.bf16 %v398_v43, %v391_v37  ;;  %v406_v5 = vsub.f32 %v1736_v9, %v405_v56  ;;  %v1350_v37 = vpack.c.bf16 %v426_v18, %v419_v13  ;;  %v1521_v43 = vmov 1.0  }
  0x83   :  { %1265 = vmatprep.subr.bf16.mxu1 %v1518_v0  ;;  %1337 = vmatprep.subr.bf16.mxu0 %v1518_v0 }
  0x84   :  { %v407_v11 = vand.u32 4294901760, %v406_v5 }
  0x86   :  { %v1275_v20 = vpack.c.bf16 %v414_v12, %v407_v11 }
  0x8a   :  { %1267 = vmatpush3.bf16.xpose.msra.mxu1 %v1266_v25  ;;  %1339 = vmatpush3.bf16.xpose.msra.mxu0 %v1338_v27  ;;  %v1347_v25 = vpack.c.bf16 %v412_v24, %v405_v56  ;;  %v420_v27 = vsub.f32 %v1750_v63, %v419_v13 }
  0x8b   :  { %1268 = vmatprep.subr.bf16.mxu1 %v1518_v0  ;;  %1340 = vmatprep.subr.bf16.mxu0 %v1518_v0 }
  0x8c   :  { %v421_v30 = vand.u32 4294901760, %v420_v27 }
  0x8e   :  { %v1278_v32 = vpack.c.bf16 %v428_v31, %v421_v30 }
  0x92   :  { %1270 = vmatpush3.bf16.xpose.msra.mxu1 %v1269_v45  ;;  %1342 = vmatpush3.bf16.xpose.msra.mxu0 %v1341_v46 }
  0x93   :  { %1271 = vmatprep.subr.bf16.mxu1 %v1518_v0  ;;  %1343 = vmatprep.subr.bf16.mxu0 %v1518_v0 }
  0x9a   :  { %1273 = vmatpush3.bf16.xpose.msra.mxu1 %v1272_v39  ;;  %1345 = vmatpush3.bf16.xpose.msra.mxu0 %v1344_v59 }
  0x9b   :  { %1274 = vmatprep.subr.bf16.mxu1 %v1518_v0  ;;  %1346 = vmatprep.subr.bf16.mxu0 %v1518_v0 }
  0xa2   :  { %1276 = vmatpush3.bf16.xpose.msra.mxu1 %v1275_v20  ;;  %1348 = vmatpush3.bf16.xpose.msra.mxu0 %v1347_v25 }
  0xa3   :  { %1277 = vmatprep.subr.bf16.mxu1 %v1518_v0  ;;  %1349 = vmatprep.subr.bf16.mxu0 %v1518_v0 }
  0xaa   :  { %1279 = vmatpush3.bf16.xpose.msra.mxu1 %v1278_v32  ;;  %1351 = vmatpush3.bf16.xpose.msra.mxu0 %v1350_v37 }
  0xab   :  { %1280 = vmatprep.subr.bf16.mxu1 %v1518_v0  ;;  %1352 = vmatprep.subr.bf16.mxu0 %v1518_v0 }
  0xb1   :  { %1090 = vmatmul.mubr.f32.vlgmr.msra.gmra.mrb[0].mxu1 %v1521_v43  ;;  %1195 = vmatmul.mubr.f32.vlgmr.msra.gmra.mrb[0].mxu0 %v1521_v43 }
  0xb2   :  { %1282 = vmatpush3.bf16.xpose.msra.mxu1 %v1281_v22  ;;  %1354 = vmatpush3.bf16.xpose.msra.mxu0 %v1596_v36  ;;  %v89_v36 = vmax.f32 %v1666_v23, 0.0003100996 }
  0xb3   :  { %1283 = vmatprep.subr.bf16.mxu1 %v1518_v0  ;;  %1355 = vmatprep.subr.bf16.mxu0 %v1518_v0 }
  0xb4   :  { %1124 = vmatprep.mubr.msk.f32.mxu1 %vm1519_vm0, %v1520_v1  ;;  %1229 = vmatprep.mubr.msk.f32.mxu0 %vm1519_vm0, %v1520_v1  ;;  %vm155_vm0 = vcmp.gt.f32.partialorder %v1675_v38, 0.0 }
  0xb5   :  { %v919_v23 = vsel %vm155_vm0, 1.0, %v1520_v1 }
  0xba   :  { %1285 = vmatpush3.bf16.xpose.msra.mxu1 %v1284_v40  ;;  %1357 = vmatpush3.bf16.xpose.msra.mxu0 %v1610_v49  ;;  %v90_v49 = vmax.f32 %v1673_v35, 0.0003100996 }
  0xbb   :  { %1286 = vmatprep.subr.bf16.mxu1 %v1518_v0  ;;  %1358 = vmatprep.subr.bf16.mxu0 %v1518_v0 }
  0xc2   :  { %1288 = vmatpush3.bf16.xpose.msra.mxu1 %v1287_v52  ;;  %1360 = vmatpush3.bf16.xpose.msra.mxu0 %v1634_v26  ;;  %v105_v26 = vmin.f32 %v89_v36, 1.0 }
  0xc3   :  { %1289 = vmatprep.subr.bf16.mxu1 %v1518_v0  ;;  %1361 = vmatprep.subr.bf16.mxu0 %v1518_v0 }
  0xc4   :  { %v200_v57 = vadd.f32 %v1660_v14, %v105_v26 }
  0xca   :  { %1291 = vmatpush3.bf16.xpose.msra.mxu1 %v1290_v61  ;;  %1363 = vmatpush3.bf16.xpose.msra.mxu0 %v1651_v60  ;;  %v917_v60 = vsel %vm153_vm14, 1.0, %v1520_v1 }
  0xcb   :  { %1292 = vmatprep.subr.bf16.mxu1 %v1518_v0  ;;  %1364 = vmatprep.subr.bf16.mxu0 %v1518_v0 }
  0xd2   :  { %1294 = vmatpush3.bf16.xpose.msra.mxu1 %v1293_v62  ;;  %1366 = vmatpush3.bf16.xpose.msra.mxu0 %v1664_v17  ;;  %v222_v17 = vadd.f32 %v917_v60, %v1662_v15 }
  0xd3   :  { %1295 = vmatprep.subr.bf16.mxu1 %v1518_v0  ;;  %1367 = vmatprep.subr.bf16.mxu0 %v1518_v0 }
  0xda   :  { %1297 = vmatpush3.bf16.xpose.msra.mxu1 %v1296_v3  ;;  %1369 = vmatpush3.bf16.xpose.msra.mxu0 %v1677_v44  ;;  %v918_v44 = vsel %vm154_vm15, 1.0, %v1520_v1 }
  0xdb   :  { %1298 = vmatprep.subr.bf16.mxu1 %v1518_v0  ;;  %1370 = vmatprep.subr.bf16.mxu0 %v1518_v0  ;;  %v223_v58 = vadd.f32 %v918_v44, %v222_v17 }
  0xdd   :  { %v224_v28 = vadd.f32 %v919_v23, %v223_v58 }
  0xdf   :  { %v225_v34 = vrot.slane %v224_v28, 4 }
  0xe1   :  { %v226_v41 = vadd.f32 %v225_v34, %v224_v28 }
  0xe2   :  { %1300 = vmatpush3.bf16.xpose.msra.mxu1 %v1299_v4  ;;  %1372 = vmatpush3.bf16.xpose.msra.mxu0 %v1734_v54 }
  0xe3   :  { %1301 = vmatprep.subr.bf16.mxu1 %v1518_v0  ;;  %1373 = vmatprep.subr.bf16.mxu0 %v1518_v0  ;;  %v106_v0 = vmin.f32 %v90_v49, 1.0  ;;  %v227_v15 = vrot.slane %v226_v41, 2 }
  0xe5   :  { %v201_v19 = vadd.f32 %v200_v57, %v106_v0  ;;  %v228_v8 = vadd.f32 %v227_v15, %v226_v41 }
  0xe7   :  { %v202_v33 = vadd.f32 %v201_v19, %v107_v16  ;;  %v229_v9 = vrot.slane %v228_v8, 1 }
  0xe9   :  { %v203_v35 = vrot.slane %v202_v33, 4  ;;  %v230_v14 = vadd.f32 %v229_v9, %v228_v8 }
  0xea   :  { %1303 = vmatpush3.bf16.xpose.msra.mxu1 %v1302_v7  ;;  %1375 = vmatpush3.bf16.xpose.msra.mxu0 %v1766_v10 }
  0xeb   :  { %v204_v42 = vadd.f32 %v203_v35, %v202_v33  ;;  %231 = vst [vmem:[#allocation8] sm:$0x1] %v230_v14 }
  0xed   :  { %v205_v53 = vrot.slane %v204_v42, 2 }
  0xef   :  { %v206_v54 = vadd.f32 %v205_v53, %v204_v42 }
  0xf1   :  { %1125 = vmatmul.mubr.f32.vlgmr.msra.gmra.mrb[0].mxu1 %v1520_v1  ;;  %1230 = vmatmul.mubr.f32.vlgmr.msra.gmra.mrb[0].mxu0 %v1521_v43  ;;  %v207_v21 = vrot.slane %v206_v54, 1 }
  0xf3   :  { %v208_v38 = vadd.f32 %v207_v21, %v206_v54 }
  0xf4   :  { %1451 = shalt.err (!%p1448_p6)
}
  0xf5   :  { %s1452_s21 = scalar_lea.hbm %s1925_s3, 16 }
  0xf6   :  { %p1453_p7 = scmp.ne.s32.totalorder %s1925_s3, %s1452_s21  ;;  %p1456_p8 = scmp.lt.u32.totalorder %s1452_s21, %s1925_s3 }
  0xf8   :  { %p1458_p9 = pnand %p1456_p8, %p1453_p7 }
  0xfa   :  { %1461 = shalt.err (!%p1458_p9)
}
  0xfb   :  { %880 = dma.vmem_to_hbm [thread:$0]  %s878_s14, 16, %s1925_s3, [#allocation9]   ;;  %209 = vst [vmem:[#allocation7] sm:$0x1] %v208_v38 }
  0xfc   :  { %s1462_s28 = scalar_lea.vmem %s868_s16, 16  ;;  %s1466_s29 = scalar_lea.vmem %s868_s16, 32 }
  0xfd   :  { %p1463_p10 = scmp.ne.s32.totalorder %s868_s16, %s1462_s28  ;;  %p1467_p11 = scmp.lt.s32.totalorder %s868_s16, %s868_s16 }
  0xfe   :  { %p1468_p12 = scmp.lt.s32.totalorder %s1466_s29, %s1462_s28 }
 0x100   :  { %p1469_p13 = por %p1468_p12, %p1467_p11 }
 0x102   :  { %p1470_p0 = pnand %p1469_p13, %p1463_p10 }
 0x104   :  { %1473 = shalt.err (!%p1470_p0)
}
 0x105   :  { %s1474_s6 = scalar_lea.hbm %s1924_s2, 16 }
 0x106   :  { %p1475_p1 = scmp.ne.s32.totalorder %s1924_s2, %s1474_s6  ;;  %p1478_p2 = scmp.lt.u32.totalorder %s1474_s6, %s1924_s2 }
 0x108   :  { %p1480_p3 = pnand %p1478_p2, %p1475_p1 }
 0x10a   :  { %1483 = shalt.err (!%p1480_p3)
}
 0x10b   :  { %870 = dma.vmem_to_hbm [thread:$0]  %s868_s16, 16, %s1924_s2, [#allocation4]  }
 0x10c   :  { %s1524_s12 = smov [#allocation10]  }
 0x10d   :  { %s887_s0 = sshll.u32 %s1524_s12, 4  ;;  %s888_s0 = int_to_ptr.vmem [resolvable:$true] %s887_s0 }
 0x10e   :  { %s1484_s13 = scalar_lea.vmem %s888_s0, 16  ;;  %s1488_s1 = scalar_lea.vmem %s888_s0, 32 }
 0x10f   :  { %p1485_p4 = scmp.ne.s32.totalorder %s888_s0, %s1484_s13  ;;  %p1489_p5 = scmp.lt.s32.totalorder %s888_s0, %s888_s0 }
 0x110   :  { %p1490_p6 = scmp.lt.s32.totalorder %s1488_s1, %s1484_s13 }
 0x112   :  { %p1491_p7 = por %p1490_p6, %p1489_p5 }
 0x114   :  { %p1492_p8 = pnand %p1491_p7, %p1485_p4 }
 0x1c4   :  { %v566_v1 = vpop.f32.mrb[0].mxu1  ;;  %v856_v22 = vpop.f32.mrb[0].mxu0 }
 0x1c5   :  { %v1376_v40 = vadd.f32 %v856_v22, %v566_v1  ;;  %v1126_v52 = vpop.f32.mrb[1].mxu1  ;;  %v1231_v61 = vpop.f32.mrb[1].mxu0 }
 0x1c7   :  { %860 = vst [vmem:[#allocation10] sm:$0x1] %v1376_v40 }
 0x1c8   :  { %1495 = shalt.err (!%p1492_p8)
}
 0x1c9   :  { %s1496_s2 = scalar_lea.hbm %s1926_s4, 16 }
 0x1ca   :  { %p1497_p9 = scmp.ne.s32.totalorder %s1926_s4, %s1496_s2  ;;  %p1500_p10 = scmp.lt.u32.totalorder %s1496_s2, %s1926_s4 }
 0x1cc   :  { %p1502_p11 = pnand %p1500_p10, %p1497_p9 }
 0x1ce   :  { %1505 = shalt.err (!%p1502_p11)
}
 0x1cf   :  { %890 = dma.vmem_to_hbm [thread:$0]  %s888_s0, 16, %s1926_s4, [#allocation9]  }
 0x1d0   :  { %1510 = dma.done.wait [#allocation4], 16  }
 0x1d1   :  { %1511 = vsyncadd [#allocation4], 4294967280 }
 0x1d2   :  { %1512 = dma.done.wait [#allocation9], 32  }
 0x1d3   :  { %1513 = vsyncadd [#allocation9], 4294967264 }
 0x1d4   :  { %900 = vsyncpa [#allocation3], 1 }
 0x1d5   :  { %901 = vsyncpa [#allocation6], 1 }
 0x1d6   :  { %902 = vsyncpa [#allocation4], 1 }
 0x1d7   :  { %903 = vsyncpa [#allocation9], 1 }

</bundles_post_ra>
